<compile_context>
chip_gen: v7x
topology: tpu7x:2x2x1
jax: 0.10.0
libtpu: 0.0.40
codegen_flags: <defaults>
</compile_context>

<pallas_src>
import functools

import jax
import jax.numpy as jnp
from jax.experimental import pallas as pl
from jax.experimental.pallas import tpu as pltpu

LANE = 128


def _round_up(n, m):
    return ((n + m - 1) // m) * m


def _pad2(a, rows, cols):
    """Zero-pad a 2-D array to (rows, cols)."""
    out = jnp.zeros((rows, cols), a.dtype)
    return out.at[: a.shape[0], : a.shape[1]].set(a)


def mlp_kernel(x_ref,
               w1, b1, w2, b2, w3, b3, w4, b4,
               w5, b5,
               o_ref):
    """Fused eval-mode MLP forward for one batch tile.

    x_ref : (tile_b, Din)      f32    raw input features (cast to bf16 here)
    wK    : (Kin, Kout)        bf16   Linear weight with BN affine folded in
    bK    : (1, Kout)          f32    Linear bias with BN affine folded in
    w5    : (1, 128)           f32    output weight row (32 real cols, 0-pad)
    b5    : (1, 1)             f32    output bias
    o_ref : (1, tile_b)        f32    lane-dense output (batch along lanes)
    """

    def dense_relu(h, w_ref, b_ref):
        # bf16 x bf16 matmul with f32 accumulation on the MXU.
        z = jnp.dot(h, w_ref[...], preferred_element_type=jnp.float32)
        z = z + b_ref[...]                                 # folded Linear+BN bias
        return jnp.maximum(z, 0.0).astype(jnp.bfloat16)    # ReLU (Dropout = id)

    h = x_ref[...].astype(jnp.bfloat16)          # in-kernel cast, no extra pass
    h = dense_relu(h, w1, b1)                    # in   -> 256
    h = dense_relu(h, w2, b2)                    # 256  -> 128
    h = dense_relu(h, w3, b3)                    # 128  -> 64  (padded to 128)
    h = dense_relu(h, w4, b4)                    # 64   -> 32  (padded to 128)

    # Output layer 32 -> 1.  An MXU pass with N=1 would force a masked 1-lane
    # store, so use a VPU multiply + XLU lane reduction and write the result
    # lane-dense along the batch axis (unmasked full-lane store).
    hf = h.astype(jnp.float32)
    row = jnp.sum(hf * w5[...], axis=-1)         # (tile_b,)
    o_ref[...] = row[None, :] + b5[...]          # (1, tile_b)


def _pick_tile_b(batch):
    """~4 grid steps (>= 2/TC on v7x), 128-multiple tile, VMEM-safe cap."""
    t = _round_up(max(pl.cdiv(batch, 4), 1), LANE)
    return min(t, 1024)


@functools.partial(jax.jit, static_argnames=("tile_b",))
def mlp_forward(x, params, tile_b=None):
    """x: (B, input_size) float32; params: folded/padded parameter tuple."""
    B, Din = x.shape
    w1, b1, w2, b2, w3, b3, w4, b4, w5, b5 = params

    if tile_b is None:
        tile_b = _pick_tile_b(B)

    # Only the batch axis is padded; features stay at their raw width.
    Bp = _round_up(B, tile_b)
    xp = x if Bp == B else jnp.zeros((Bp, Din), x.dtype).at[:B].set(x)
    n_tiles = Bp // tile_b

    # Parameters: whole-array blocks, constant block index -> DMA'd once and
    # kept resident in VMEM across grid steps (no per-step re-issue).
    param_spec = pl.BlockSpec(None, lambda i: (0, 0))
    in_specs = [pl.BlockSpec((tile_b, Din), lambda i: (i, 0))] + [param_spec] * 10

    out = pl.pallas_call(
        mlp_kernel,
        out_shape=jax.ShapeDtypeStruct((1, Bp), jnp.float32),
        grid=(n_tiles,),
        in_specs=in_specs,
        # Lane-dense output blocks: each grid step writes tile_b contiguous lanes.
        out_specs=pl.BlockSpec((1, tile_b), lambda i: (0, i)),
        compiler_params=pltpu.CompilerParams(
            dimension_semantics=("parallel",)),
    )(xp, w1, b1, w2, b2, w3, b3, w4, b4, w5, b5)

    return out.reshape(Bp, 1)[:B]


def init_params(key, input_size):
    """PyTorch-shaped init; returns (raw params, folded/padded kernel params).

    Linear: W (in, out), b (out,) ~ U(-1/sqrt(in), 1/sqrt(in)).
    BatchNorm1d (eval): scale = gamma / sqrt(running_var + eps),
                        W' = W * scale,  b' = b*scale + beta - rmean*scale.
    Hidden widths 64/32 are zero-padded to 128 lanes (padded biases are zero,
    next layer's padded weight rows are zero -> numerically exact).
    The input width is NOT padded.
    """
    eps = 1e-5
    keys = jax.random.split(key, 26)
    kit = iter(keys)

    dims = [(input_size, 256), (256, 128), (128, 64), (64, 32)]
    pin_list = [input_size, 256, 128, 128]
    pout_list = [256, 128, 128, 128]

    raw = []
    kparams = []
    for (din, dout), pin, pout in zip(dims, pin_list, pout_list):
        bound = din ** -0.5
        w = jax.random.uniform(next(kit), (din, dout), jnp.float32, -bound, bound)
        b = jax.random.uniform(next(kit), (dout,), jnp.float32, -bound, bound)
        gamma = 1.0 + 0.1 * jax.random.normal(next(kit), (dout,), jnp.float32)
        beta = 0.1 * jax.random.normal(next(kit), (dout,), jnp.float32)
        rmean = 0.1 * jax.random.normal(next(kit), (dout,), jnp.float32)
        rvar = 1.0 + 0.1 * jax.random.uniform(next(kit), (dout,), jnp.float32)
        raw.append((w, b, gamma, beta, rmean, rvar))

        scale = gamma * jax.lax.rsqrt(rvar + eps)
        w_f = w * scale[None, :]
        b_f = b * scale + beta - rmean * scale
        kparams.append(_pad2(w_f, pin, pout).astype(jnp.bfloat16))
        kparams.append(_pad2(b_f[None, :], 1, pout))           # f32

    # Output Linear 32 -> 1, stored as a padded f32 row vector for the
    # VPU-multiply + lane-reduce epilogue.
    din, dout = 32, 1
    bound = din ** -0.5
    w5 = jax.random.uniform(next(kit), (din, dout), jnp.float32, -bound, bound)
    b5 = jax.random.uniform(next(kit), (dout,), jnp.float32, -bound, bound)
    raw.append((w5, b5))
    kparams.append(_pad2(w5.T, 1, LANE))                        # (1, 128) f32
    kparams.append(b5.reshape(1, 1))                            # (1, 1)  f32
    return raw, tuple(kparams)


def mlp_reference_folded(x, params):
    """Plain-JAX reference with the kernel's exact numerics (folded, bf16)."""
    w1, b1, w2, b2, w3, b3, w4, b4, w5, b5 = params
    h = x.astype(jnp.bfloat16)
    for w, b in ((w1, b1), (w2, b2), (w3, b3), (w4, b4)):
        z = jnp.dot(h.astype(jnp.float32), w.astype(jnp.float32)) + b
        h = jnp.maximum(z, 0.0).astype(jnp.bfloat16)
    hf = h.astype(jnp.float32)
    return jnp.sum(hf * w5, axis=-1, keepdims=True) + b5[0, 0]


def mlp_reference_unfused(x, raw):
    """PyTorch-style eval forward: f32 Linear, then BN(running stats), ReLU."""
    eps = 1e-5
    h = x
    for (w, b, gamma, beta, rmean, rvar) in raw[:-1]:
        z = h @ w + b
        z = (z - rmean) * gamma * jax.lax.rsqrt(rvar + eps) + beta
        h = jnp.maximum(z, 0.0)
    w5, b5 = raw[-1]
    return h @ w5 + b5


if __name__ == "__main__":
    key = jax.random.PRNGKey(0)
    k_x, k_p = jax.random.split(key)

    # Non-multiple-of-tile batch exercises the batch-padding path; tile_b=128,
    # grid=4 (>= 2 steps per TensorCore on v7x).
    batch, input_size = 500, 32
    x = jax.random.normal(k_x, (batch, input_size), jnp.float32)
    raw_params, kernel_params = init_params(k_p, input_size)

    out = mlp_forward(x, kernel_params)
    out = jax.block_until_ready(out)
    assert out.shape == (batch, 1), out.shape

    # Kernel-plumbing check: exact-numerics reference (folded params, bf16).
    ref_folded = mlp_reference_folded(x, kernel_params)
    err_folded = float(jnp.max(jnp.abs(out - ref_folded)))
    assert err_folded < 2e-2, err_folded

    # Numerics-vs-PyTorch check: unfolded f32 Linear-then-BN eval path; bounds
    # the BN-fold + bf16 rounding error of the fused kernel.
    ref_f32 = mlp_reference_unfused(x, raw_params)
    err_f32 = float(jnp.max(jnp.abs(out - ref_f32)))
    assert err_f32 < 2e-1, err_f32

    print("KERNEL_OK")
</pallas_src>

<mosaic_0001>
module attributes {stable_mosaic.version = 11 : i64} {
  func.func @mlp_kernel(%arg0: i32, %arg1: memref<128x32xf32, #tpu.memory_space<vmem>>, %arg2: memref<32x256xbf16, #tpu.memory_space<vmem>>, %arg3: memref<1x256xf32, #tpu.memory_space<vmem>>, %arg4: memref<256x128xbf16, #tpu.memory_space<vmem>>, %arg5: memref<1x128xf32, #tpu.memory_space<vmem>>, %arg6: memref<128x128xbf16, #tpu.memory_space<vmem>>, %arg7: memref<1x128xf32, #tpu.memory_space<vmem>>, %arg8: memref<128x128xbf16, #tpu.memory_space<vmem>>, %arg9: memref<1x128xf32, #tpu.memory_space<vmem>>, %arg10: memref<1x128xf32, #tpu.memory_space<vmem>>, %arg11: memref<1x1xf32, #tpu.memory_space<vmem>>, %arg12: memref<1x128xf32, #tpu.memory_space<vmem>>) attributes {dimension_semantics = [#tpu.dimension_semantics<parallel>], iteration_bounds = array<i64: 4>, scalar_prefetch = 0 : i64, scratch_operands = 0 : i64, tpu.core_type = #tpu.core_type<tc>, window_params = [{transform_indices = @transform_0, window_bounds = array<i64: 128, 32>}, {pipeline_mode = #tpu.pipeline_mode<synchronous>, transform_indices = @transform_1, window_bounds = array<i64: 32, 256>}, {pipeline_mode = #tpu.pipeline_mode<synchronous>, transform_indices = @transform_2, window_bounds = array<i64: 1, 256>}, {pipeline_mode = #tpu.pipeline_mode<synchronous>, transform_indices = @transform_3, window_bounds = array<i64: 256, 128>}, {pipeline_mode = #tpu.pipeline_mode<synchronous>, transform_indices = @transform_4, window_bounds = array<i64: 1, 128>}, {pipeline_mode = #tpu.pipeline_mode<synchronous>, transform_indices = @transform_5, window_bounds = array<i64: 128, 128>}, {pipeline_mode = #tpu.pipeline_mode<synchronous>, transform_indices = @transform_6, window_bounds = array<i64: 1, 128>}, {pipeline_mode = #tpu.pipeline_mode<synchronous>, transform_indices = @transform_7, window_bounds = array<i64: 128, 128>}, {pipeline_mode = #tpu.pipeline_mode<synchronous>, transform_indices = @transform_8, window_bounds = array<i64: 1, 128>}, {pipeline_mode = #tpu.pipeline_mode<synchronous>, transform_indices = @transform_9, window_bounds = array<i64: 1, 128>}, {pipeline_mode = #tpu.pipeline_mode<synchronous>, transform_indices = @transform_10, window_bounds = array<i64: 1, 1>}, {transform_indices = @transform_11, window_bounds = array<i64: 1, 128>}]} {
    %c0 = arith.constant 0 : index
    %c0_0 = arith.constant 0 : index
    %0 = vector.load %arg1[%c0, %c0_0] : memref<128x32xf32, #tpu.memory_space<vmem>>, vector<128x32xf32>
    %1 = arith.truncf %0 : vector<128x32xf32> to vector<128x32xbf16>
    %c0_1 = arith.constant 0 : index
    %c0_2 = arith.constant 0 : index
    %2 = vector.load %arg2[%c0_1, %c0_2] : memref<32x256xbf16, #tpu.memory_space<vmem>>, vector<32x256xbf16>
    %cst = arith.constant dense<0.000000e+00> : vector<128x256xf32>
    %3 = tpu.matmul %1, %2, %cst {dimension_numbers = #tpu.dot_dimension_numbers<[1], [0], [0], [1], [0, 0, 1, 1], [], []>} : vector<128x32xbf16>, vector<32x256xbf16>, vector<128x256xf32> -> vector<128x256xf32>
    %c0_3 = arith.constant 0 : index
    %c0_4 = arith.constant 0 : index
    %4 = vector.load %arg3[%c0_3, %c0_4] : memref<1x256xf32, #tpu.memory_space<vmem>>, vector<1x256xf32>
    %5 = vector.broadcast %4 : vector<1x256xf32> to vector<128x256xf32>
    %6 = arith.addf %3, %5 : vector<128x256xf32>
    %cst_5 = arith.constant 0.000000e+00 : f32
    %7 = vector.broadcast %cst_5 : f32 to vector<128x256xf32>
    %8 = arith.maximumf %6, %7 : vector<128x256xf32>
    %9 = arith.truncf %8 : vector<128x256xf32> to vector<128x256xbf16>
    %c0_6 = arith.constant 0 : index
    %c0_7 = arith.constant 0 : index
    %10 = vector.load %arg4[%c0_6, %c0_7] : memref<256x128xbf16, #tpu.memory_space<vmem>>, vector<256x128xbf16>
    %cst_8 = arith.constant dense<0.000000e+00> : vector<128x128xf32>
    %11 = tpu.matmul %9, %10, %cst_8 {dimension_numbers = #tpu.dot_dimension_numbers<[1], [0], [0], [1], [0, 0, 1, 1], [], []>} : vector<128x256xbf16>, vector<256x128xbf16>, vector<128x128xf32> -> vector<128x128xf32>
    %c0_9 = arith.constant 0 : index
    %c0_10 = arith.constant 0 : index
    %12 = vector.load %arg5[%c0_9, %c0_10] : memref<1x128xf32, #tpu.memory_space<vmem>>, vector<1x128xf32>
    %13 = vector.broadcast %12 : vector<1x128xf32> to vector<128x128xf32>
    %14 = arith.addf %11, %13 : vector<128x128xf32>
    %cst_11 = arith.constant 0.000000e+00 : f32
    %15 = vector.broadcast %cst_11 : f32 to vector<128x128xf32>
    %16 = arith.maximumf %14, %15 : vector<128x128xf32>
    %17 = arith.truncf %16 : vector<128x128xf32> to vector<128x128xbf16>
    %c0_12 = arith.constant 0 : index
    %c0_13 = arith.constant 0 : index
    %18 = vector.load %arg6[%c0_12, %c0_13] : memref<128x128xbf16, #tpu.memory_space<vmem>>, vector<128x128xbf16>
    %cst_14 = arith.constant dense<0.000000e+00> : vector<128x128xf32>
    %19 = tpu.matmul %17, %18, %cst_14 {dimension_numbers = #tpu.dot_dimension_numbers<[1], [0], [0], [1], [0, 0, 1, 1], [], []>} : vector<128x128xbf16>, vector<128x128xbf16>, vector<128x128xf32> -> vector<128x128xf32>
    %c0_15 = arith.constant 0 : index
    %c0_16 = arith.constant 0 : index
    %20 = vector.load %arg7[%c0_15, %c0_16] : memref<1x128xf32, #tpu.memory_space<vmem>>, vector<1x128xf32>
    %21 = vector.broadcast %20 : vector<1x128xf32> to vector<128x128xf32>
    %22 = arith.addf %19, %21 : vector<128x128xf32>
    %cst_17 = arith.constant 0.000000e+00 : f32
    %23 = vector.broadcast %cst_17 : f32 to vector<128x128xf32>
    %24 = arith.maximumf %22, %23 : vector<128x128xf32>
    %25 = arith.truncf %24 : vector<128x128xf32> to vector<128x128xbf16>
    %c0_18 = arith.constant 0 : index
    %c0_19 = arith.constant 0 : index
    %26 = vector.load %arg8[%c0_18, %c0_19] : memref<128x128xbf16, #tpu.memory_space<vmem>>, vector<128x128xbf16>
    %cst_20 = arith.constant dense<0.000000e+00> : vector<128x128xf32>
    %27 = tpu.matmul %25, %26, %cst_20 {dimension_numbers = #tpu.dot_dimension_numbers<[1], [0], [0], [1], [0, 0, 1, 1], [], []>} : vector<128x128xbf16>, vector<128x128xbf16>, vector<128x128xf32> -> vector<128x128xf32>
    %c0_21 = arith.constant 0 : index
    %c0_22 = arith.constant 0 : index
    %28 = vector.load %arg9[%c0_21, %c0_22] : memref<1x128xf32, #tpu.memory_space<vmem>>, vector<1x128xf32>
    %29 = vector.broadcast %28 : vector<1x128xf32> to vector<128x128xf32>
    %30 = arith.addf %27, %29 : vector<128x128xf32>
    %cst_23 = arith.constant 0.000000e+00 : f32
    %31 = vector.broadcast %cst_23 : f32 to vector<128x128xf32>
    %32 = arith.maximumf %30, %31 : vector<128x128xf32>
    %33 = arith.truncf %32 : vector<128x128xf32> to vector<128x128xbf16>
    %34 = arith.extf %33 : vector<128x128xbf16> to vector<128x128xf32>
    %c0_24 = arith.constant 0 : index
    %c0_25 = arith.constant 0 : index
    %35 = vector.load %arg10[%c0_24, %c0_25] : memref<1x128xf32, #tpu.memory_space<vmem>>, vector<1x128xf32>
    %36 = vector.broadcast %35 : vector<1x128xf32> to vector<128x128xf32>
    %37 = arith.mulf %34, %36 : vector<128x128xf32>
    %cst_26 = arith.constant dense<0.000000e+00> : vector<128xf32>
    %38 = vector.multi_reduction <add>, %37, %cst_26 [1] : vector<128x128xf32> to vector<128xf32>
    %39 = vector.shape_cast %38 : vector<128xf32> to vector<1x128xf32>
    %c0_27 = arith.constant 0 : index
    %c0_28 = arith.constant 0 : index
    %40 = vector.load %arg11[%c0_27, %c0_28] : memref<1x1xf32, #tpu.memory_space<vmem>>, vector<1x1xf32>
    %41 = vector.broadcast %40 : vector<1x1xf32> to vector<1x128xf32>
    %42 = arith.addf %39, %41 : vector<1x128xf32>
    %c0_29 = arith.constant 0 : index
    %c0_30 = arith.constant 0 : index
    %43 = vector.load %arg12[%c0_29, %c0_30] : memref<1x128xf32, #tpu.memory_space<vmem>>, vector<1x128xf32>
    tpu.vector_store %arg12[%c0_29, %c0_30], %42 {strides = array<i32>} : memref<1x128xf32, #tpu.memory_space<vmem>>, vector<1x128xf32>,
    return
  }
  func.func @transform_0(%arg0: i32) -> (i32, i32) {
    %c0_i32 = arith.constant 0 : i32
    %c0_i32_0 = arith.constant 0 : i32
    return %arg0, %c0_i32 : i32, i32
  }
  func.func @transform_1(%arg0: i32) -> (i32, i32) {
    %c0_i32 = arith.constant 0 : i32
    %c0_i32_0 = arith.constant 0 : i32
    %c0_i32_1 = arith.constant 0 : i32
    return %c0_i32, %c0_i32_0 : i32, i32
  }
  func.func @transform_2(%arg0: i32) -> (i32, i32) {
    %c0_i32 = arith.constant 0 : i32
    %c0_i32_0 = arith.constant 0 : i32
    %c0_i32_1 = arith.constant 0 : i32
    return %c0_i32, %c0_i32_0 : i32, i32
  }
  func.func @transform_3(%arg0: i32) -> (i32, i32) {
    %c0_i32 = arith.constant 0 : i32
    %c0_i32_0 = arith.constant 0 : i32
    %c0_i32_1 = arith.constant 0 : i32
    return %c0_i32, %c0_i32_0 : i32, i32
  }
  func.func @transform_4(%arg0: i32) -> (i32, i32) {
    %c0_i32 = arith.constant 0 : i32
    %c0_i32_0 = arith.constant 0 : i32
    %c0_i32_1 = arith.constant 0 : i32
    return %c0_i32, %c0_i32_0 : i32, i32
  }
  func.func @transform_5(%arg0: i32) -> (i32, i32) {
    %c0_i32 = arith.constant 0 : i32
    %c0_i32_0 = arith.constant 0 : i32
    %c0_i32_1 = arith.constant 0 : i32
    return %c0_i32, %c0_i32_0 : i32, i32
  }
  func.func @transform_6(%arg0: i32) -> (i32, i32) {
    %c0_i32 = arith.constant 0 : i32
    %c0_i32_0 = arith.constant 0 : i32
    %c0_i32_1 = arith.constant 0 : i32
    return %c0_i32, %c0_i32_0 : i32, i32
  }
  func.func @transform_7(%arg0: i32) -> (i32, i32) {
    %c0_i32 = arith.constant 0 : i32
    %c0_i32_0 = arith.constant 0 : i32
    %c0_i32_1 = arith.constant 0 : i32
    return %c0_i32, %c0_i32_0 : i32, i32
  }
  func.func @transform_8(%arg0: i32) -> (i32, i32) {
    %c0_i32 = arith.constant 0 : i32
    %c0_i32_0 = arith.constant 0 : i32
    %c0_i32_1 = arith.constant 0 : i32
    return %c0_i32, %c0_i32_0 : i32, i32
  }
  func.func @transform_9(%arg0: i32) -> (i32, i32) {
    %c0_i32 = arith.constant 0 : i32
    %c0_i32_0 = arith.constant 0 : i32
    %c0_i32_1 = arith.constant 0 : i32
    return %c0_i32, %c0_i32_0 : i32, i32
  }
  func.func @transform_10(%arg0: i32) -> (i32, i32) {
    %c0_i32 = arith.constant 0 : i32
    %c0_i32_0 = arith.constant 0 : i32
    %c0_i32_1 = arith.constant 0 : i32
    return %c0_i32, %c0_i32_0 : i32, i32
  }
  func.func @transform_11(%arg0: i32) -> (i32, i32) {
    %c0_i32 = arith.constant 0 : i32
    %c0_i32_0 = arith.constant 0 : i32
    return %c0_i32, %arg0 : i32, i32
  }
}

</mosaic_0001>

<bundles_post_ra>
// kernel: mlp_forward.1
= control target key start
LH: loop header
LB: loop body
LE: loop exit
PB: predicated region body
PF: predicated region fallthrough
CT: control target
= control target key end

     0   :  { %s1901_s19 = smov 0   ;;  %s2258_s0 = inlined_call_operand.vmem [shape: f32[512,32], index: 0, kind: input, shape index: {}]   ;;  %s2259_s1 = inlined_call_operand.vmem [shape: bf16[32,256], index: 1, kind: input, shape index: {}]   ;;  %s2260_s2 = inlined_call_operand.vmem [shape: f32[1,256], index: 2, kind: input, shape index: {}]   ;;  %s2261_s3 = inlined_call_operand.vmem [shape: bf16[256,128], index: 3, kind: input, shape index: {}]   ;;  %s2262_s4 = inlined_call_operand.vmem [shape: f32[1,128], index: 4, kind: input, shape index: {}]   ;;  %s2263_s5 = inlined_call_operand.vmem [shape: bf16[128,128], index: 5, kind: input, shape index: {}]   ;;  %s2264_s6 = inlined_call_operand.vmem [shape: f32[1,128], index: 6, kind: input, shape index: {}]   ;;  %s2265_s7 = inlined_call_operand.vmem [shape: bf16[128,128], index: 7, kind: input, shape index: {}]   ;;  %s2266_s8 = inlined_call_operand.vmem [shape: f32[1,128], index: 8, kind: input, shape index: {}]   ;;  %s2267_s9 = inlined_call_operand.vmem [shape: f32[1,128], index: 9, kind: input, shape index: {}]   ;;  %s2268_s10 = inlined_call_operand.<no memory space> [shape: f32[1,1], index: 10, kind: input, shape index: {}]   ;;  %s2269_s11 = inlined_call_operand.vmem [shape: f32[1,512], index: 11, kind: output, shape index: {}]  }
   0x1   :  { %v16_v0 = vstv %s2268_s10 }
   0x2   :  { %17 = vst [vmem:[#allocation2] sm:$0x1] %v16_v0 }
   0x3 LB: > { %s1907_s20 = sadd.s32 4294967295, %s1835_s19   ;;  %p1551_p0 = scmp.ge.s32.totalorder %s1835_s19, 1  ;;  %s1835_s19 = sphi %s1901_s19, %s23_s19  }
   0x4   : > { %p340_p1 = scmp.lt.s32.totalorder %s1835_s19, 5 }
   0x6   : > { %p341_p2 = pnand %p1551_p0, %p340_p1 }
   0x7   : > { %v1791_v1 = vld [vmem:[%s2259_s1 + $0x4] ss:$8 sps:$4 sm:$0xff] (!%p341_p2)   ;;  %s1552_s10 = sshll.u32 (!%p341_p2), %s1907_s20, 4  ;;  %v1793_v2 = vld [vmem:[%s2259_s1] ss:$8 sps:$4 sm:$0xff] (!%p341_p2)   ;;  %v1837_v3 = vmov (!%p341_p2), 0   ;;  %v418_v51 = vlaneseq (!%p341_p2) }
   0x8   : > { %344 = sbr.rel (%p341_p2) target bundleno = 1142 (0x476), region = 64  ;;  %505 = vmatprep.mubr.bf16.mxu0 (!%p341_p2), %v1837_v3  ;;  %p379_p3 = scmp.lt.s32.totalorder (!%p341_p2), %s1552_s10, 63  ;;  %1789 = vset.pattern.permute.xlu1 (!%p341_p2), %v1837_v3  ;;  %v1794_v4 = vld [vmem:[%s2259_s1 + $0x14] ss:$8 sps:$4 sm:$0xff] (!%p341_p2)   ;;  %v1796_v5 = vld [vmem:[%s2259_s1 + $0x10] ss:$8 sps:$4 sm:$0xff] (!%p341_p2)  }
   0x9   : > { %473 = vmatprep.subr.bf16.mxu0 (!%p341_p2), %v1791_v1  ;;  %1790 = vset.pattern.permute.xlu0 (!%p341_p2), %v1837_v3  ;;  %v1797_v6 = vld [vmem:[%s2261_s3 + $0x40] sm:$0xff] (!%p341_p2)   ;;  %v1799_v8 = vld [vmem:[%s2261_s3 + $0x48] sm:$0xff] (!%p341_p2)   ;;  %vm448_vm0 = vcmask (!%p341_p2), 261120   ;;  %v1801_v15 = vld [vmem:[%s2261_s3 + $0x50] sm:$0xff] (!%p341_p2)   ;;  %v2027_v52 = vshrl.u32 (!%p341_p2), %v418_v51, 7  ;;  %vm1398_vm1 = vcmask (!%p341_p2), 130112  }
   0xa   : > { %474 = vmatpush1.bf16.msra.mxu0 (!%p341_p2), %v1793_v2  ;;  %v1798_v7 = vld [vmem:[%s2261_s3] sm:$0xff] (!%p341_p2)   ;;  %1604 = vmatprep.subr.bf16.mxu1 (!%p341_p2), %v1797_v6  ;;  %v1800_v9 = vld [vmem:[%s2261_s3 + $0x8] sm:$0xff] (!%p341_p2)   ;;  %v1802_v16 = vld [vmem:[%s2261_s3 + $0x10] sm:$0xff] (!%p341_p2)   ;;  %vm1405_vm2 = vcmask (!%p341_p2), 195712   ;;  %vm1412_vm3 = vcmask (!%p341_p2), 261312   ;;  %vm1419_vm4 = vcmask (!%p341_p2), 326912  }
   0xb   : > { %475 = vmatprep.subr.bf16.mxu0 (!%p341_p2), %v1794_v4  ;;  %1605 = vmatpush3.bf16.msra.mxu1 (!%p341_p2), %v1798_v7  ;;  %v1803_v18 = vld [vmem:[%s2261_s3 + $0x58] sm:$0xff] (!%p341_p2)   ;;  %v1805_v20 = vld [vmem:[%s2261_s3 + $0x60] sm:$0xff] (!%p341_p2)   ;;  %v1807_v24 = vld [vmem:[%s2261_s3 + $0x68] sm:$0xff] (!%p341_p2)   ;;  %v420_v53 = vsub.s32 (!%p341_p2), 0, %v2027_v52  ;;  %v424_v55 = vsub.s32 (!%p341_p2), 1, %v2027_v52  ;;  %vm1426_vm5 = vcmask (!%p341_p2), 392512  }
   0xc   : > { %1606 = vmatprep.subr.bf16.mxu1 (!%p341_p2), %v1799_v8  ;;  %v1804_v19 = vld [vmem:[%s2261_s3 + $0x18] sm:$0xff] (!%p341_p2)   ;;  %v1806_v23 = vld [vmem:[%s2261_s3 + $0x20] sm:$0xff] (!%p341_p2)   ;;  %v1808_v41 = vld [vmem:[%s2261_s3 + $0x28] sm:$0xff] (!%p341_p2)   ;;  %vm1433_vm6 = vcmask (!%p341_p2), 458112   ;;  %vm1440_vm7 = vcmask (!%p341_p2), 523712   ;;  %vm1447_vm8 = vcmask (!%p341_p2), 589312  }
   0xd   : > { %v1809_v42 = vld [vmem:[%s2261_s3 + $0x70] sm:$0xff] (!%p341_p2)   ;;  %v1811_v44 = vld [vmem:[%s2261_s3 + $0x78] sm:$0xff] (!%p341_p2)   ;;  %v1813_v46 = vld [vmem:[%s2263_s5] sm:$0xff] (!%p341_p2)   ;;  %vm1454_vm9 = vcmask (!%p341_p2), 654912   ;;  %p384_p4 = scmp.lt.s32.totalorder (!%p341_p2), %s1907_s20, 3  ;;  %vm1461_vm10 = vcmask (!%p341_p2), 720512  }
   0xe   : > { %476 = vmatpush1.bf16.msra.mxu0 (!%p341_p2), %v1796_v5  ;;  %v1810_v43 = vld [vmem:[%s2261_s3 + $0x30] sm:$0xff] (!%p341_p2)   ;;  %v1812_v45 = vld [vmem:[%s2261_s3 + $0x38] sm:$0xff] (!%p341_p2)   ;;  %v1814_v47 = vld [vmem:[%s2263_s5 + $0x8] sm:$0xff] (!%p341_p2)   ;;  %vm1468_vm11 = vcmask (!%p341_p2), 786112   ;;  %vm1475_vm12 = vcmask (!%p341_p2), 851712   ;;  %vm1482_vm13 = vcmask (!%p341_p2), 917312  }
   0xf   : > { %s2271_s10 = smov (!%p379_p3, %s1552_s10), 63  ;;  %1607 = vmatpush3.bf16.msra.mxu1 %v1800_v9  ;;  %1700 = vmatprep.subr.bf16.mxu0 %v1813_v46  ;;  %v1815_v48 = vld [vmem:[%s2263_s5 + $0x10] sm:$0xff]   ;;  %v1816_v49 = vld [vmem:[%s2263_s5 + $0x18] sm:$0xff]   ;;  %v1817_v50 = vld [vmem:[%s2263_s5 + $0x20] sm:$0xff]   ;;  %s2273_s20 = smov (!%p384_p4, %s1907_s20), 3  ;;  %vm1489_vm14 = vcmask 982912  }
  0x10   : > { %s1553_s14 = sshll.u32 %s2271_s10, 3  ;;  %1608 = vmatprep.subr.bf16.mxu1 %v1801_v15  ;;  %v416_v54 = vld [vmem:[%s2260_s2] sm:$0x3]  ;;  %vm1496_vm15 = vcmask 1048512   ;;  %s386_s18 = scalar_lea.vmem %s2269_s11, %s2273_s20 }
  0x11   : > { %s1939_s21 = scalar_lea.vmem %s2258_s0, %s1553_s14  ;;  %v2036_v56 = vrot.slane %v416_v54, %v420_v53  ;;  %v2038_v57 = vrot.slane %v416_v54, %v424_v55 }
  0x12   : > { %v388_v10 = vld [vmem:[%s1939_s21] sm:$0xff]  ;;  %v389_v11 = vld [vmem:[%s1939_s21 + $0x8] sm:$0xff]  ;;  %v390_v13 = vld [vmem:[%s1939_s21 + $0x10] sm:$0xff] }
  0x13   : > { %v404_v12 = vpack.c.bf16 %v389_v11, %v388_v10  ;;  %v391_v14 = vld [vmem:[%s1939_s21 + $0x18] sm:$0xff]  ;;  %1609 = vmatpush3.bf16.msra.mxu1 %v1802_v16  ;;  %v392_v21 = vld [vmem:[%s1939_s21 + $0x20] sm:$0xff]  ;;  %v393_v22 = vld [vmem:[%s1939_s21 + $0x28] sm:$0xff] }
  0x14   : > { %v405_v17 = vpack.c.bf16 %v391_v14, %v390_v13  ;;  %1610 = vmatprep.subr.bf16.mxu1 %v1803_v18  ;;  %v406_v25 = vpack.c.bf16 %v393_v22, %v392_v21  ;;  %v394_v26 = vld [vmem:[%s1939_s21 + $0x30] sm:$0xff]  ;;  %v395_v27 = vld [vmem:[%s1939_s21 + $0x38] sm:$0xff]  ;;  %v396_v29 = vld [vmem:[%s1939_s21 + $0x40] sm:$0xff] }
  0x15   : > { %1558 = vmatmul.mubr.msk.bf16.vlgmr.msra.gmra.mrb[0].mxu0 %vm448_vm0, %v404_v12  ;;  %v407_v28 = vpack.c.bf16 %v395_v27, %v394_v26  ;;  %v397_v30 = vld [vmem:[%s1939_s21 + $0x48] sm:$0xff]  ;;  %v398_v32 = vld [vmem:[%s1939_s21 + $0x50] sm:$0xff]  ;;  %v399_v33 = vld [vmem:[%s1939_s21 + $0x58] sm:$0xff] }
  0x16   : > { %515 = vmatprep.mubr.bf16.mxu0 %v1837_v3  ;;  %v408_v31 = vpack.c.bf16 %v397_v30, %v396_v29  ;;  %v409_v34 = vpack.c.bf16 %v399_v33, %v398_v32  ;;  %v400_v35 = vld [vmem:[%s1939_s21 + $0x60] sm:$0xff]  ;;  %v401_v36 = vld [vmem:[%s1939_s21 + $0x68] sm:$0xff]  ;;  %v402_v38 = vld [vmem:[%s1939_s21 + $0x70] sm:$0xff]  ;;  %1701 = vmatpush3.bf16.msra.mxu0 %v1813_v46 }
  0x17   : > { %1611 = vmatpush3.bf16.msra.mxu1 %v1804_v19  ;;  %v410_v37 = vpack.c.bf16 %v401_v36, %v400_v35  ;;  %v403_v39 = vld [vmem:[%s1939_s21 + $0x78] sm:$0xff]  ;;  %1702 = vmatprep.subr.bf16.mxu0 %v1814_v47 }
  0x18   : > { %1612 = vmatprep.subr.bf16.mxu1 %v1805_v20  ;;  %v411_v40 = vpack.c.bf16 %v403_v39, %v402_v38 }
  0x1a   : > { %1703 = vmatpush3.bf16.msra.mxu0 %v1814_v47 }
  0x1b   : > { %1613 = vmatpush3.bf16.msra.mxu1 %v1806_v23  ;;  %1704 = vmatprep.subr.bf16.mxu0 %v1815_v48 }
  0x1c   : > { %1614 = vmatprep.subr.bf16.mxu1 %v1807_v24 }
  0x1d   : > { %1559 = vmatmul.mubr.msk.bf16.gmra.mrb[4].mxu0 %vm448_vm0, %v405_v17 }
  0x1e   : > { %525 = vmatprep.mubr.bf16.mxu0 %v1837_v3  ;;  %1705 = vmatpush3.bf16.msra.mxu0 %v1815_v48 }
  0x1f   : > { %1615 = vmatpush3.bf16.msra.mxu1 %v1808_v41  ;;  %1706 = vmatprep.subr.bf16.mxu0 %v1816_v49 }
  0x20   : > { %1616 = vmatprep.subr.bf16.mxu1 %v1809_v42 }
  0x22   : > { %1707 = vmatpush3.bf16.msra.mxu0 %v1816_v49 }
  0x23   : > { %1617 = vmatpush3.bf16.msra.mxu1 %v1810_v43  ;;  %1708 = vmatprep.subr.bf16.mxu0 %v1817_v50 }
  0x24   : > { %1618 = vmatprep.subr.bf16.mxu1 %v1811_v44 }
  0x25   : > { %1560 = vmatmul.mubr.msk.bf16.gmra.mrb[8].mxu0 %vm448_vm0, %v406_v25 }
  0x26   : > { %535 = vmatprep.mubr.bf16.mxu0 %v1837_v3  ;;  %1709 = vmatpush3.bf16.msra.mxu0 %v1817_v50 }
  0x27   : > { %1619 = vmatpush3.bf16.msra.mxu1 %v1812_v45 }
  0x2d   : > { %1561 = vmatmul.mubr.msk.bf16.gmra.mrb[12].mxu0 %vm448_vm0, %v407_v28 }
  0x2e   : > { %545 = vmatprep.mubr.bf16.mxu0 %v1837_v3 }
  0x35   : > { %1562 = vmatmul.mubr.msk.bf16.gmra.mrb[16].mxu0 %vm448_vm0, %v408_v31 }
  0x36   : > { %555 = vmatprep.mubr.bf16.mxu0 %v1837_v3 }
  0x3d   : > { %1563 = vmatmul.mubr.msk.bf16.gmra.mrb[20].mxu0 %vm448_vm0, %v409_v34 }
  0x3e   : > { %565 = vmatprep.mubr.bf16.mxu0 %v1837_v3 }
  0x45   : > { %1564 = vmatmul.mubr.msk.bf16.gmra.mrb[24].mxu0 %vm448_vm0, %v410_v37 }
  0x46   : > { %575 = vmatprep.mubr.bf16.mxu0 %v1837_v3 }
  0x4d   : > { %1565 = vmatmul.mubr.msk.bf16.gmra.mrb[28].mxu0 %vm448_vm0, %v411_v40 }
  0xe8   : > { %v507_v58 = vpop.f32.mrb[0].mxu0 }
  0xe9   : > { %v508_v59 = vadd.f32 %v507_v58, %v2036_v56  ;;  %v509_v60 = vpop.f32.mrb[1].mxu0 }
  0xea   : > { %v510_v61 = vadd.f32 %v509_v60, %v2038_v57  ;;  %v511_v62 = vpop.f32.mrb[2].mxu0 }
  0xeb   : > { %v512_v63 = vadd.f32 %v511_v62, %v2036_v56  ;;  %v513_v0 = vpop.f32.mrb[3].mxu0  ;;  %v586_v2 = vmax.f32 %v508_v59, 0.0 }
  0xec   : > { %v514_v1 = vadd.f32 %v513_v0, %v2038_v57  ;;  %v587_v4 = vmax.f32 %v510_v61, 0.0 }
  0xed   : > { %v588_v3 = vmax.f32 %v512_v63, 0.0 }
  0xee   : > { %v589_v5 = vmax.f32 %v514_v1, 0.0 }
  0xef   : > { %v618_v6 = vpack.c.bf16 %v588_v3, %v586_v2 }
  0xf0   : > { %v517_v7 = vpop.f32.mrb[4].mxu0  ;;  %v619_v8 = vpack.c.bf16 %v589_v5, %v587_v4 }
  0xf1   : > { %v518_v9 = vadd.f32 %v517_v7, %v2036_v56  ;;  %v519_v10 = vpop.f32.mrb[5].mxu0 }
  0xf2   : > { %v520_v11 = vadd.f32 %v519_v10, %v2038_v57  ;;  %v521_v12 = vpop.f32.mrb[6].mxu0  ;;  %801 = vmatprep.mubr.bf16.mxu1 %v619_v8 }
  0xf3   : > { %v522_v13 = vadd.f32 %v521_v12, %v2036_v56  ;;  %v523_v14 = vpop.f32.mrb[7].mxu0  ;;  %802 = vmatmul.mubr.bf16.vlgmr.msra.gmra.mrb[0].mxu1 %v618_v6  ;;  %v590_v16 = vmax.f32 %v518_v9, 0.0 }
  0xf4   : > { %v524_v15 = vadd.f32 %v523_v14, %v2038_v57  ;;  %v591_v18 = vmax.f32 %v520_v11, 0.0 }
  0xf5   : > { %v592_v17 = vmax.f32 %v522_v13, 0.0 }
  0xf6   : > { %v593_v19 = vmax.f32 %v524_v15, 0.0 }
  0xf7   : > { %v620_v20 = vpack.c.bf16 %v592_v17, %v590_v16 }
  0xf8   : > { %v621_v21 = vpack.c.bf16 %v593_v19, %v591_v18  ;;  %v527_v22 = vpop.f32.mrb[8].mxu0 }
  0xf9   : > { %v528_v23 = vadd.f32 %v527_v22, %v2036_v56  ;;  %v529_v24 = vpop.f32.mrb[9].mxu0 }
  0xfa   : > { %v530_v25 = vadd.f32 %v529_v24, %v2038_v57  ;;  %v531_v26 = vpop.f32.mrb[10].mxu0  ;;  %809 = vmatprep.mubr.bf16.mxu1 %v621_v21 }
  0xfb   : > { %v532_v27 = vadd.f32 %v531_v26, %v2036_v56  ;;  %v533_v28 = vpop.f32.mrb[11].mxu0  ;;  %810 = vmatmul.mubr.bf16.gmra.mrb[4].mxu1 %v620_v20  ;;  %v594_v30 = vmax.f32 %v528_v23, 0.0 }
  0xfc   : > { %v534_v29 = vadd.f32 %v533_v28, %v2038_v57  ;;  %v595_v32 = vmax.f32 %v530_v25, 0.0 }
  0xfd   : > { %v596_v31 = vmax.f32 %v532_v27, 0.0 }
  0xfe   : > { %v597_v33 = vmax.f32 %v534_v29, 0.0 }
  0xff   : > { %v622_v34 = vpack.c.bf16 %v596_v31, %v594_v30 }
 0x100   : > { %v623_v35 = vpack.c.bf16 %v597_v33, %v595_v32  ;;  %v537_v36 = vpop.f32.mrb[12].mxu0 }
 0x101   : > { %v538_v37 = vadd.f32 %v537_v36, %v2036_v56  ;;  %v539_v38 = vpop.f32.mrb[13].mxu0 }
 0x102   : > { %v540_v39 = vadd.f32 %v539_v38, %v2038_v57  ;;  %v541_v40 = vpop.f32.mrb[14].mxu0  ;;  %817 = vmatprep.mubr.bf16.mxu1 %v623_v35 }
 0x103   : > { %v542_v41 = vadd.f32 %v541_v40, %v2036_v56  ;;  %v543_v42 = vpop.f32.mrb[15].mxu0  ;;  %818 = vmatmul.mubr.bf16.gmra.mrb[8].mxu1 %v622_v34  ;;  %v598_v44 = vmax.f32 %v538_v37, 0.0 }
 0x104   : > { %v544_v43 = vadd.f32 %v543_v42, %v2038_v57  ;;  %v599_v46 = vmax.f32 %v540_v39, 0.0 }
 0x105   : > { %v600_v45 = vmax.f32 %v542_v41, 0.0 }
 0x106   : > { %v601_v47 = vmax.f32 %v544_v43, 0.0 }
 0x107   : > { %v624_v48 = vpack.c.bf16 %v600_v45, %v598_v44 }
 0x108   : > { %v625_v49 = vpack.c.bf16 %v601_v47, %v599_v46  ;;  %v547_v50 = vpop.f32.mrb[16].mxu0  ;;  %v1818_v47 = vld [vmem:[%s2263_s5 + $0x28] sm:$0xff]  }
 0x109   : > { %v548_v54 = vadd.f32 %v547_v50, %v2036_v56  ;;  %v549_v55 = vpop.f32.mrb[17].mxu0  ;;  %1710 = vmatprep.subr.bf16.mxu0 %v1818_v47  ;;  %v1823_v50 = vld [vmem:[%s2265_s7 + $0x10] sm:$0xff]  }
 0x10a   : > { %v550_v58 = vadd.f32 %v549_v55, %v2038_v57  ;;  %v551_v59 = vpop.f32.mrb[18].mxu0  ;;  %825 = vmatprep.mubr.bf16.mxu1 %v625_v49  ;;  %1711 = vmatpush3.bf16.msra.mxu0 %v1818_v47  ;;  %v1822_v49 = vld [vmem:[%s2265_s7 + $0x8] sm:$0xff]   ;;  %v2099_v55 = vld [vmem:[%s2265_s7 + $0x20] sm:$0xff]  }
 0x10b   : > { %v602_v60 = vmax.f32 %v548_v54, 0.0  ;;  %v552_v61 = vadd.f32 %v551_v59, %v2036_v56  ;;  %v553_v62 = vpop.f32.mrb[19].mxu0  ;;  %826 = vmatmul.mubr.bf16.gmra.mrb[12].mxu1 %v624_v48  ;;  %v1821_v48 = vld [vmem:[%s2265_s7] sm:$0xff]   ;;  %v2093_v54 = vld [vmem:[%s2265_s7 + $0x18] sm:$0xff]  }
 0x10c   : > { %v603_v63 = vmax.f32 %v550_v58, 0.0  ;;  %v554_v0 = vadd.f32 %v553_v62, %v2038_v57  ;;  %1764 = vmatprep.subr.bf16.mxu1 %v1821_v48  ;;  %v2106_v58 = vld [vmem:[%s2265_s7 + $0x28] sm:$0xff]  }
 0x10d   : > { %v604_v1 = vmax.f32 %v552_v61, 0.0  ;;  %1772 = vmatpush3.bf16.msra.mxu1 %v1821_v48 }
 0x10e   : > { %v605_v2 = vmax.f32 %v554_v0, 0.0  ;;  %1765 = vmatprep.subr.bf16.mxu1 %v1822_v49 }
 0x10f   : > { %v626_v3 = vpack.c.bf16 %v604_v1, %v602_v60  ;;  %v2114_v60 = vld [vmem:[%s2262_s4] ss:$0 sm:$0xff] }
 0x110   : > { %v627_v4 = vpack.c.bf16 %v605_v2, %v603_v63  ;;  %v557_v5 = vpop.f32.mrb[20].mxu0 }
 0x111   : > { %v558_v6 = vadd.f32 %v557_v5, %v2036_v56  ;;  %v559_v7 = vpop.f32.mrb[21].mxu0  ;;  %1773 = vmatpush3.bf16.msra.mxu1 %v1822_v49 }
 0x112   : > { %v560_v8 = vadd.f32 %v559_v7, %v2038_v57  ;;  %v561_v9 = vpop.f32.mrb[22].mxu0  ;;  %833 = vmatprep.mubr.bf16.mxu1 %v627_v4  ;;  %1766 = vmatprep.subr.bf16.mxu1 %v1823_v50 }
 0x113   : > { %v606_v10 = vmax.f32 %v558_v6, 0.0  ;;  %v562_v11 = vadd.f32 %v561_v9, %v2036_v56  ;;  %v563_v12 = vpop.f32.mrb[23].mxu0  ;;  %834 = vmatmul.mubr.bf16.gmra.mrb[16].mxu1 %v626_v3 }
 0x114   : > { %v607_v13 = vmax.f32 %v560_v8, 0.0  ;;  %v564_v14 = vadd.f32 %v563_v12, %v2038_v57 }
 0x115   : > { %v608_v15 = vmax.f32 %v562_v11, 0.0  ;;  %1774 = vmatpush3.bf16.msra.mxu1 %v1823_v50 }
 0x116   : > { %v609_v16 = vmax.f32 %v564_v14, 0.0  ;;  %1767 = vmatprep.subr.bf16.mxu1 %v2093_v54 }
 0x117   : > { %v628_v17 = vpack.c.bf16 %v608_v15, %v606_v10 }
 0x118   : > { %v629_v18 = vpack.c.bf16 %v609_v16, %v607_v13  ;;  %v567_v19 = vpop.f32.mrb[24].mxu0 }
 0x119   : > { %v568_v20 = vadd.f32 %v567_v19, %v2036_v56  ;;  %v569_v21 = vpop.f32.mrb[25].mxu0  ;;  %1775 = vmatpush3.bf16.msra.mxu1 %v2093_v54 }
 0x11a   : > { %v570_v22 = vadd.f32 %v569_v21, %v2038_v57  ;;  %v571_v23 = vpop.f32.mrb[26].mxu0  ;;  %841 = vmatprep.mubr.bf16.mxu1 %v629_v18  ;;  %1768 = vmatprep.subr.bf16.mxu1 %v2099_v55 }
 0x11b   : > { %v610_v24 = vmax.f32 %v568_v20, 0.0  ;;  %v572_v25 = vadd.f32 %v571_v23, %v2036_v56  ;;  %v573_v26 = vpop.f32.mrb[27].mxu0  ;;  %842 = vmatmul.mubr.bf16.gmra.mrb[20].mxu1 %v628_v17 }
 0x11c   : > { %v611_v27 = vmax.f32 %v570_v22, 0.0  ;;  %v574_v28 = vadd.f32 %v573_v26, %v2038_v57 }
 0x11d   : > { %v612_v29 = vmax.f32 %v572_v25, 0.0  ;;  %1776 = vmatpush3.bf16.msra.mxu1 %v2099_v55 }
 0x11e   : > { %v613_v30 = vmax.f32 %v574_v28, 0.0  ;;  %1769 = vmatprep.subr.bf16.mxu1 %v2106_v58 }
 0x11f   : > { %v630_v31 = vpack.c.bf16 %v612_v29, %v610_v24 }
 0x120   : > { %v631_v32 = vpack.c.bf16 %v613_v30, %v611_v27  ;;  %v577_v33 = vpop.f32.mrb[28].mxu0 }
 0x121   : > { %v578_v34 = vadd.f32 %v577_v33, %v2036_v56  ;;  %v579_v35 = vpop.f32.mrb[29].mxu0  ;;  %1777 = vmatpush3.bf16.msra.mxu1 %v2106_v58 }
 0x122   : > { %v580_v36 = vadd.f32 %v579_v35, %v2038_v57  ;;  %v581_v37 = vpop.f32.mrb[30].mxu0  ;;  %849 = vmatprep.mubr.bf16.mxu1 %v631_v32 }
 0x123   : > { %v614_v38 = vmax.f32 %v578_v34, 0.0  ;;  %v582_v39 = vadd.f32 %v581_v37, %v2036_v56  ;;  %v583_v40 = vpop.f32.mrb[31].mxu0  ;;  %850 = vmatmul.mubr.bf16.gmra.mrb[24].mxu1 %v630_v31  ;;  %v1819_v56 = vld [vmem:[%s2263_s5 + $0x30] sm:$0xff]  }
 0x124   : > { %v615_v41 = vmax.f32 %v580_v36, 0.0  ;;  %v584_v42 = vadd.f32 %v583_v40, %v2038_v57  ;;  %1712 = vmatprep.subr.bf16.mxu0 %v1819_v56  ;;  %v1820_v57 = vld [vmem:[%s2263_s5 + $0x38] sm:$0xff]  }
 0x125   : > { %v616_v43 = vmax.f32 %v582_v39, 0.0  ;;  %1713 = vmatpush3.bf16.msra.mxu0 %v1819_v56 }
 0x126   : > { %v617_v44 = vmax.f32 %v584_v42, 0.0  ;;  %1714 = vmatprep.subr.bf16.mxu0 %v1820_v57 }
 0x127   : > { %v632_v45 = vpack.c.bf16 %v616_v43, %v614_v38 }
 0x128   : > { %v633_v46 = vpack.c.bf16 %v617_v44, %v615_v41 }
 0x129   : > { %1715 = vmatpush3.bf16.msra.mxu0 %v1820_v57 }
 0x12a   : > { %857 = vmatprep.mubr.bf16.mxu1 %v633_v46  ;;  %1732 = vmatprep.subr.bf16.mxu0 %v1821_v48 }
 0x12b   : > { %858 = vmatmul.mubr.bf16.gmra.mrb[28].mxu1 %v632_v45 }
 0x1c6   : > { %v1620_v59 = vpop.f32.mrb[0].mxu1 }
 0x1c7   : > { %v1621_v61 = vpop.f32.mrb[1].mxu1 }
 0x1c8   : > { %v1622_v62 = vadd.f32 %v1621_v61, %v1620_v59  ;;  %v1623_v63 = vpop.f32.mrb[2].mxu1 }
 0x1c9   : > { %v1624_v0 = vpop.f32.mrb[3].mxu1 }
 0x1ca   : > { %v804_v1 = vadd.f32 %v1622_v62, %v2114_v60  ;;  %v1625_v2 = vadd.f32 %v1624_v0, %v1623_v63 }
 0x1cc   : > { %v807_v3 = vadd.f32 %v1625_v2, %v2114_v60  ;;  %v866_v4 = vmax.f32 %v804_v1, 0.0 }
 0x1ce   : > { %v867_v5 = vmax.f32 %v807_v3, 0.0  ;;  %v1626_v6 = vpop.f32.mrb[4].mxu1 }
 0x1cf   : > { %v1627_v7 = vpop.f32.mrb[5].mxu1 }
 0x1d0   : > { %v1628_v8 = vadd.f32 %v1627_v7, %v1626_v6  ;;  %v1629_v9 = vpop.f32.mrb[6].mxu1  ;;  %v882_v10 = vpack.c.bf16 %v867_v5, %v866_v4 }
 0x1d1   : > { %v1630_v11 = vpop.f32.mrb[7].mxu1 }
 0x1d2   : > { %v812_v12 = vadd.f32 %v1628_v8, %v2114_v60  ;;  %v1631_v13 = vadd.f32 %v1630_v11, %v1629_v9  ;;  %1716 = vmatprep.mubr.bf16.mxu0 %v882_v10 }
 0x1d4   : > { %v815_v14 = vadd.f32 %v1631_v13, %v2114_v60  ;;  %v868_v15 = vmax.f32 %v812_v12, 0.0 }
 0x1d6   : > { %v869_v16 = vmax.f32 %v815_v14, 0.0  ;;  %v1632_v17 = vpop.f32.mrb[8].mxu1 }
 0x1d7   : > { %v1633_v18 = vpop.f32.mrb[9].mxu1 }
 0x1d8   : > { %v883_v19 = vpack.c.bf16 %v869_v16, %v868_v15  ;;  %v1634_v20 = vadd.f32 %v1633_v18, %v1632_v17  ;;  %v1635_v21 = vpop.f32.mrb[10].mxu1 }
 0x1d9   : > { %v1636_v22 = vpop.f32.mrb[11].mxu1 }
 0x1da   : > { %v820_v23 = vadd.f32 %v1634_v20, %v2114_v60  ;;  %v1637_v24 = vadd.f32 %v1636_v22, %v1635_v21  ;;  %1717 = vmatmul.mubr.bf16.vlgmr.msra.gmra.mrb[32].mxu0 %v883_v19 }
 0x1db   : > { %1733 = vmatpush3.bf16.msra.mxu0 %v1821_v48 }
 0x1dc   : > { %v823_v25 = vadd.f32 %v1637_v24, %v2114_v60  ;;  %1734 = vmatprep.subr.bf16.mxu0 %v1822_v49  ;;  %v870_v26 = vmax.f32 %v820_v23, 0.0  ;;  %v1827_v24 = vld [vmem:[%s2265_s7 + $0x30] sm:$0xff]  }
 0x1dd   : > { %1770 = vmatprep.subr.bf16.mxu1 %v1827_v24 }
 0x1de   : > { %v871_v27 = vmax.f32 %v823_v25, 0.0  ;;  %v1638_v28 = vpop.f32.mrb[12].mxu1  ;;  %1778 = vmatpush3.bf16.msra.mxu1 %v1827_v24  ;;  %v1828_v25 = vld [vmem:[%s2265_s7 + $0x38] sm:$0xff]  }
 0x1df   : > { %v1639_v29 = vpop.f32.mrb[13].mxu1  ;;  %1735 = vmatpush3.bf16.msra.mxu0 %v1822_v49  ;;  %1771 = vmatprep.subr.bf16.mxu1 %v1828_v25 }
 0x1e0   : > { %v1640_v30 = vadd.f32 %v1639_v29, %v1638_v28  ;;  %v1641_v31 = vpop.f32.mrb[14].mxu1  ;;  %v884_v32 = vpack.c.bf16 %v871_v27, %v870_v26  ;;  %1736 = vmatprep.subr.bf16.mxu0 %v1823_v50 }
 0x1e1   : > { %v1642_v33 = vpop.f32.mrb[15].mxu1 }
 0x1e2   : > { %v828_v34 = vadd.f32 %v1640_v30, %v2114_v60  ;;  %v1643_v35 = vadd.f32 %v1642_v33, %v1641_v31  ;;  %1720 = vmatprep.mubr.bf16.mxu0 %v884_v32  ;;  %1779 = vmatpush3.bf16.msra.mxu1 %v1828_v25 }
 0x1e3   : > { %1737 = vmatpush3.bf16.msra.mxu0 %v1823_v50 }
 0x1e4   : > { %v831_v36 = vadd.f32 %v1643_v35, %v2114_v60  ;;  %1738 = vmatprep.subr.bf16.mxu0 %v2093_v54  ;;  %v872_v37 = vmax.f32 %v828_v34, 0.0 }
 0x1e6   : > { %v873_v38 = vmax.f32 %v831_v36, 0.0  ;;  %v1644_v39 = vpop.f32.mrb[16].mxu1 }
 0x1e7   : > { %v1645_v40 = vpop.f32.mrb[17].mxu1  ;;  %1739 = vmatpush3.bf16.msra.mxu0 %v2093_v54 }
 0x1e8   : > { %v885_v41 = vpack.c.bf16 %v873_v38, %v872_v37  ;;  %v1646_v42 = vadd.f32 %v1645_v40, %v1644_v39  ;;  %v1647_v43 = vpop.f32.mrb[18].mxu1  ;;  %1740 = vmatprep.subr.bf16.mxu0 %v2099_v55 }
 0x1e9   : > { %v1648_v44 = vpop.f32.mrb[19].mxu1 }
 0x1ea   : > { %1721 = vmatmul.mubr.bf16.gmra.mrb[36].mxu0 %v885_v41  ;;  %v836_v45 = vadd.f32 %v1646_v42, %v2114_v60  ;;  %v1649_v46 = vadd.f32 %v1648_v44, %v1647_v43 }
 0x1eb   : > { %1741 = vmatpush3.bf16.msra.mxu0 %v2099_v55 }
 0x1ec   : > { %v874_v47 = vmax.f32 %v836_v45, 0.0  ;;  %v839_v56 = vadd.f32 %v1649_v46, %v2114_v60  ;;  %1742 = vmatprep.subr.bf16.mxu0 %v2106_v58 }
 0x1ee   : > { %v875_v57 = vmax.f32 %v839_v56, 0.0  ;;  %v1650_v48 = vpop.f32.mrb[20].mxu1 }
 0x1ef   : > { %v1651_v49 = vpop.f32.mrb[21].mxu1  ;;  %1743 = vmatpush3.bf16.msra.mxu0 %v2106_v58 }
 0x1f0   : > { %v1652_v50 = vadd.f32 %v1651_v49, %v1650_v48  ;;  %v1653_v54 = vpop.f32.mrb[22].mxu1  ;;  %v886_v59 = vpack.c.bf16 %v875_v57, %v874_v47  ;;  %1744 = vmatprep.subr.bf16.mxu0 %v1827_v24 }
 0x1f1   : > { %v1654_v61 = vpop.f32.mrb[23].mxu1 }
 0x1f2   : > { %v844_v62 = vadd.f32 %v1652_v50, %v2114_v60  ;;  %v1655_v63 = vadd.f32 %v1654_v61, %v1653_v54  ;;  %1724 = vmatprep.mubr.bf16.mxu0 %v886_v59 }
 0x1f3   : > { %1745 = vmatpush3.bf16.msra.mxu0 %v1827_v24 }
 0x1f4   : > { %v876_v0 = vmax.f32 %v844_v62, 0.0  ;;  %v847_v55 = vadd.f32 %v1655_v63, %v2114_v60  ;;  %1746 = vmatprep.subr.bf16.mxu0 %v1828_v25 }
 0x1f6   : > { %v877_v1 = vmax.f32 %v847_v55, 0.0  ;;  %v1656_v2 = vpop.f32.mrb[24].mxu1 }
 0x1f7   : > { %v1657_v3 = vpop.f32.mrb[25].mxu1  ;;  %1747 = vmatpush3.bf16.msra.mxu0 %v1828_v25 }
 0x1f8   : > { %v887_v4 = vpack.c.bf16 %v877_v1, %v876_v0  ;;  %v1658_v5 = vadd.f32 %v1657_v3, %v1656_v2  ;;  %v1659_v6 = vpop.f32.mrb[26].mxu1 }
 0x1f9   : > { %v1660_v7 = vpop.f32.mrb[27].mxu1 }
 0x1fa   : > { %1725 = vmatmul.mubr.bf16.gmra.mrb[40].mxu0 %v887_v4  ;;  %v852_v58 = vadd.f32 %v1658_v5, %v2114_v60  ;;  %v1661_v8 = vadd.f32 %v1660_v7, %v1659_v6 }
 0x1fc   : > { %v878_v9 = vmax.f32 %v852_v58, 0.0  ;;  %v855_v10 = vadd.f32 %v1661_v8, %v2114_v60 }
 0x1fe   : > { %v879_v11 = vmax.f32 %v855_v10, 0.0  ;;  %v1662_v12 = vpop.f32.mrb[28].mxu1 }
 0x1ff   : > { %v1663_v13 = vpop.f32.mrb[29].mxu1 }
 0x200   : > { %v1664_v14 = vadd.f32 %v1663_v13, %v1662_v12  ;;  %v1665_v15 = vpop.f32.mrb[30].mxu1  ;;  %v888_v16 = vpack.c.bf16 %v879_v11, %v878_v9 }
 0x201   : > { %v1666_v17 = vpop.f32.mrb[31].mxu1 }
 0x202   : > { %v860_v18 = vadd.f32 %v1664_v14, %v2114_v60  ;;  %v1667_v19 = vadd.f32 %v1666_v17, %v1665_v15  ;;  %1728 = vmatprep.mubr.bf16.mxu0 %v888_v16 }
 0x204   : > { %v880_v20 = vmax.f32 %v860_v18, 0.0  ;;  %v863_v21 = vadd.f32 %v1667_v19, %v2114_v60  ;;  %v1583_v60 = vld [vmem:[%s2264_s6] ss:$0 sm:$0xff] }
 0x206   : > { %v881_v22 = vmax.f32 %v863_v21, 0.0 }
 0x208   : > { %v889_v23 = vpack.c.bf16 %v881_v22, %v880_v20  ;;  %v2150_v22 = vld [vmem:[%s2266_s8] ss:$0 sm:$0xff] }
 0x20a   : > { %1729 = vmatmul.mubr.bf16.gmra.mrb[44].mxu0 %v889_v23 }
 0x2ad   : > { %v1718_v26 = vpop.f32.mrb[32].mxu0 }
 0x2ae   : > { %v1004_v27 = vadd.f32 %v1718_v26, %v1583_v60  ;;  %v995_v28 = vpop.f32.mrb[33].mxu0 }
 0x2af   : > { %v996_v29 = vadd.f32 %v1583_v60, %v995_v28  ;;  %v1719_v30 = vpop.f32.mrb[34].mxu0 }
 0x2b0   : > { %v1007_v31 = vadd.f32 %v1719_v30, %v1583_v60  ;;  %v998_v32 = vpop.f32.mrb[35].mxu0  ;;  %v1060_v34 = vmax.f32 %v1004_v27, 0.0 }
 0x2b1   : > { %v999_v33 = vadd.f32 %v1583_v60, %v998_v32  ;;  %v1058_v36 = vmax.f32 %v996_v29, 0.0 }
 0x2b2   : > { %v1061_v35 = vmax.f32 %v1007_v31, 0.0 }
 0x2b3   : > { %v1059_v37 = vmax.f32 %v999_v33, 0.0 }
 0x2b4   : > { %v1075_v38 = vpack.c.bf16 %v1061_v35, %v1060_v34 }
 0x2b5   : > { %v1074_v39 = vpack.c.bf16 %v1059_v37, %v1058_v36  ;;  %v2159_v36 = vld [vmem:[%s2267_s9] ss:$0 sm:$0xff] }
 0x2b7   : > { %1748 = vmatprep.mubr.bf16.mxu0 %v1074_v39 }
 0x2b8   : > { %1749 = vmatmul.mubr.bf16.vlgmr.msra.gmra.mrb[48].mxu0 %v1075_v38 }
 0x2bd   : > { %v1722_v40 = vpop.f32.mrb[36].mxu0 }
 0x2be   : > { %v1020_v41 = vadd.f32 %v1722_v40, %v1583_v60  ;;  %v1011_v42 = vpop.f32.mrb[37].mxu0 }
 0x2bf   : > { %v1012_v43 = vadd.f32 %v1583_v60, %v1011_v42  ;;  %v1723_v44 = vpop.f32.mrb[38].mxu0 }
 0x2c0   : > { %v1023_v45 = vadd.f32 %v1723_v44, %v1583_v60  ;;  %v1014_v46 = vpop.f32.mrb[39].mxu0  ;;  %v1064_v56 = vmax.f32 %v1020_v41, 0.0 }
 0x2c1   : > { %v1015_v47 = vadd.f32 %v1583_v60, %v1014_v46  ;;  %v1062_v48 = vmax.f32 %v1012_v43, 0.0 }
 0x2c2   : > { %v1065_v57 = vmax.f32 %v1023_v45, 0.0 }
 0x2c3   : > { %v1063_v49 = vmax.f32 %v1015_v47, 0.0 }
 0x2c4   : > { %v1077_v50 = vpack.c.bf16 %v1065_v57, %v1064_v56 }
 0x2c5   : > { %v1076_v54 = vpack.c.bf16 %v1063_v49, %v1062_v48 }
 0x2c7   : > { %1752 = vmatprep.mubr.bf16.mxu1 %v1076_v54 }
 0x2c8   : > { %1753 = vmatmul.mubr.bf16.vlgmr.msra.gmra.mrb[32].mxu1 %v1077_v50 }
 0x2cd   : > { %v1726_v59 = vpop.f32.mrb[40].mxu0 }
 0x2ce   : > { %v1036_v61 = vadd.f32 %v1726_v59, %v1583_v60  ;;  %v1027_v62 = vpop.f32.mrb[41].mxu0 }
 0x2cf   : > { %v1028_v63 = vadd.f32 %v1583_v60, %v1027_v62  ;;  %v1727_v0 = vpop.f32.mrb[42].mxu0 }
 0x2d0   : > { %v1068_v55 = vmax.f32 %v1036_v61, 0.0  ;;  %v1039_v1 = vadd.f32 %v1727_v0, %v1583_v60  ;;  %v1030_v2 = vpop.f32.mrb[43].mxu0 }
 0x2d1   : > { %v1066_v3 = vmax.f32 %v1028_v63, 0.0  ;;  %v1031_v4 = vadd.f32 %v1583_v60, %v1030_v2 }
 0x2d2   : > { %v1069_v5 = vmax.f32 %v1039_v1, 0.0 }
 0x2d3   : > { %v1067_v6 = vmax.f32 %v1031_v4, 0.0 }
 0x2d4   : > { %v1079_v7 = vpack.c.bf16 %v1069_v5, %v1068_v55 }
 0x2d5   : > { %v1078_v58 = vpack.c.bf16 %v1067_v6, %v1066_v3 }
 0x2d7   : > { %1756 = vmatprep.mubr.bf16.mxu1 %v1078_v58 }
 0x2d8   : > { %1757 = vmatmul.mubr.bf16.gmra.mrb[36].mxu1 %v1079_v7 }
 0x2dd   : > { %v1730_v8 = vpop.f32.mrb[44].mxu0 }
 0x2de   : > { %v1052_v9 = vadd.f32 %v1730_v8, %v1583_v60  ;;  %v1043_v10 = vpop.f32.mrb[45].mxu0 }
 0x2df   : > { %v1044_v11 = vadd.f32 %v1583_v60, %v1043_v10  ;;  %v1731_v12 = vpop.f32.mrb[46].mxu0 }
 0x2e0   : > { %v1072_v13 = vmax.f32 %v1052_v9, 0.0  ;;  %v1055_v14 = vadd.f32 %v1731_v12, %v1583_v60  ;;  %v1046_v15 = vpop.f32.mrb[47].mxu0 }
 0x2e1   : > { %v1070_v16 = vmax.f32 %v1044_v11, 0.0  ;;  %v1047_v17 = vadd.f32 %v1583_v60, %v1046_v15 }
 0x2e2   : > { %v1073_v18 = vmax.f32 %v1055_v14, 0.0 }
 0x2e3   : > { %v1071_v19 = vmax.f32 %v1047_v17, 0.0 }
 0x2e4   : > { %v1081_v20 = vpack.c.bf16 %v1073_v18, %v1072_v13 }
 0x2e5   : > { %v1080_v21 = vpack.c.bf16 %v1071_v19, %v1070_v16 }
 0x2e7   : > { %1760 = vmatprep.mubr.bf16.mxu1 %v1080_v21 }
 0x2e8   : > { %1761 = vmatmul.mubr.bf16.gmra.mrb[40].mxu1 %v1081_v20 }
 0x38b   : > { %v1750_v23 = vpop.f32.mrb[48].mxu0 }
 0x38c   : > { %v1196_v24 = vadd.f32 %v1750_v23, %v2150_v22  ;;  %v1187_v25 = vpop.f32.mrb[49].mxu0 }
 0x38d   : > { %v1188_v26 = vadd.f32 %v2150_v22, %v1187_v25  ;;  %v1751_v27 = vpop.f32.mrb[50].mxu0 }
 0x38e   : > { %v1199_v60 = vadd.f32 %v1751_v27, %v2150_v22  ;;  %v1190_v28 = vpop.f32.mrb[51].mxu0  ;;  %v1252_v30 = vmax.f32 %v1196_v24, 0.0  ;;  %v1345_v27 = vld [vmem:[#allocation2] sm:$0x1] }
 0x38f   : > { %v1191_v29 = vadd.f32 %v2150_v22, %v1190_v28  ;;  %v1250_v32 = vmax.f32 %v1188_v26, 0.0 }
 0x390   : > { %v1253_v31 = vmax.f32 %v1199_v60, 0.0 }
 0x391   : > { %v1251_v33 = vmax.f32 %v1191_v29, 0.0 }
 0x392   : > { %v1267_v34 = vpack.c.bf16 %v1253_v31, %v1252_v30 }
 0x393   : > { %v1266_v35 = vpack.c.bf16 %v1251_v33, %v1250_v32 }
 0x394   : > { %v1276_v37 = vunpack.c.l.bf16 %v1267_v34  ;;  %v1277_v40 = vunpack.c.h.bf16 %v1267_v34 }
 0x395   : > { %v1274_v38 = vunpack.c.l.bf16 %v1266_v35  ;;  %v1275_v42 = vunpack.c.h.bf16 %v1266_v35 }
 0x396   : > { %v1299_v39 = vmul.f32 %v2159_v36, %v1276_v37  ;;  %v1300_v43 = vmul.f32 %v2159_v36, %v1277_v40 }
 0x397   : > { %v1297_v41 = vmul.f32 %v2159_v36, %v1274_v38  ;;  %v1298_v45 = vmul.f32 %v2159_v36, %v1275_v42 }
 0x398   : > { %1317 = vadd.xlane.f32.xlu1 %v1299_v39 }
 0x399   : > { %1313 = vadd.xlane.f32.xlu0 %v1297_v41 }
 0x39b   : > { %v1754_v44 = vpop.f32.mrb[32].mxu1 }
 0x39c   : > { %v1212_v46 = vadd.f32 %v1754_v44, %v2150_v22  ;;  %v1203_v47 = vpop.f32.mrb[33].mxu1  ;;  %1319 = vadd.xlane.f32.xlu1 %v1300_v43 }
 0x39d   : > { %v1204_v56 = vadd.f32 %v2150_v22, %v1203_v47  ;;  %v1755_v57 = vpop.f32.mrb[34].mxu1  ;;  %1315 = vadd.xlane.f32.xlu0 %v1298_v45 }
 0x39e   : > { %v1215_v48 = vadd.f32 %v1755_v57, %v2150_v22  ;;  %v1206_v49 = vpop.f32.mrb[35].mxu1  ;;  %v1256_v54 = vmax.f32 %v1212_v46, 0.0 }
 0x39f   : > { %v1207_v50 = vadd.f32 %v2150_v22, %v1206_v49  ;;  %v1254_v61 = vmax.f32 %v1204_v56, 0.0 }
 0x3a0   : > { %v1257_v59 = vmax.f32 %v1215_v48, 0.0 }
 0x3a1   : > { %v1255_v62 = vmax.f32 %v1207_v50, 0.0 }
 0x3a2   : > { %v1269_v63 = vpack.c.bf16 %v1257_v59, %v1256_v54 }
 0x3a3   : > { %v1268_v0 = vpack.c.bf16 %v1255_v62, %v1254_v61 }
 0x3a4   : > { %v1280_v55 = vunpack.c.l.bf16 %v1269_v63  ;;  %v1281_v6 = vunpack.c.h.bf16 %v1269_v63 }
 0x3a5   : > { %v1279_v1 = vunpack.c.h.bf16 %v1268_v0  ;;  %v1278_v3 = vunpack.c.l.bf16 %v1268_v0 }
 0x3a6   : > { %v1303_v2 = vmul.f32 %v2159_v36, %v1280_v55  ;;  %v1304_v14 = vmul.f32 %v2159_v36, %v1281_v6 }
 0x3a7   : > { %v1302_v4 = vmul.f32 %v2159_v36, %v1279_v1  ;;  %v1301_v5 = vmul.f32 %v2159_v36, %v1278_v3  ;;  %v2190_v1 = vand.u32 127, %v418_v51 }
 0x3a8   : > { %1325 = vadd.xlane.f32.xlu0 %v1303_v2 }
 0x3a9   : > { %1323 = vadd.xlane.f32.xlu1 %v1302_v4  ;;  %v1391_v51 = vsub.s32 %v2190_v1, %v2027_v52 }
 0x3ab   : > { %v1758_v7 = vpop.f32.mrb[36].mxu1 }
 0x3ac   : > { %v1228_v58 = vadd.f32 %v1758_v7, %v2150_v22  ;;  %v1219_v8 = vpop.f32.mrb[37].mxu1  ;;  %1321 = vadd.xlane.f32.xlu0 %v1301_v5  ;;  %v1400_v5 = vadd.s32 4294967280, %v2190_v1 }
 0x3ad   : > { %v1220_v9 = vadd.f32 %v2150_v22, %v1219_v8  ;;  %v1759_v10 = vpop.f32.mrb[38].mxu1 }
 0x3ae   : > { %v1260_v11 = vmax.f32 %v1228_v58, 0.0  ;;  %v1231_v12 = vadd.f32 %v1759_v10, %v2150_v22  ;;  %v1222_v13 = vpop.f32.mrb[39].mxu1  ;;  %v1403_v10 = vsub.s32 %v1400_v5, %v2027_v52 }
 0x3af   : > { %v1258_v15 = vmax.f32 %v1220_v9, 0.0  ;;  %v1223_v16 = vadd.f32 %v2150_v22, %v1222_v13 }
 0x3b0   : > { %v1261_v17 = vmax.f32 %v1231_v12, 0.0  ;;  %1327 = vadd.xlane.f32.xlu0 %v1304_v14  ;;  %v1407_v12 = vadd.s32 4294967272, %v2190_v1 }
 0x3b1   : > { %v1259_v18 = vmax.f32 %v1223_v16, 0.0 }
 0x3b2   : > { %v1271_v19 = vpack.c.bf16 %v1261_v17, %v1260_v11 }
 0x3b3   : > { %v1270_v20 = vpack.c.bf16 %v1259_v18, %v1258_v15  ;;  %v1414_v15 = vadd.s32 4294967264, %v2190_v1  ;;  %v1410_v18 = vsub.s32 %v1407_v12, %v2027_v52 }
 0x3b4   : > { %v1284_v21 = vunpack.c.l.bf16 %v1271_v19  ;;  %v1285_v23 = vunpack.c.h.bf16 %v1271_v19 }
 0x3b5   : > { %v1282_v25 = vunpack.c.l.bf16 %v1270_v20  ;;  %v1283_v28 = vunpack.c.h.bf16 %v1270_v20  ;;  %v1421_v20 = vadd.s32 4294967256, %v2190_v1 }
 0x3b6   : > { %v1307_v24 = vmul.f32 %v2159_v36, %v1284_v21  ;;  %v1308_v26 = vmul.f32 %v2159_v36, %v1285_v23 }
 0x3b7   : > { %v1305_v60 = vmul.f32 %v2159_v36, %v1282_v25  ;;  %v1306_v38 = vmul.f32 %v2159_v36, %v1283_v28  ;;  %v1424_v28 = vsub.s32 %v1421_v20, %v2027_v52 }
 0x3b8   : > { %1333 = vadd.xlane.f32.xlu0 %v1307_v24  ;;  %v1417_v24 = vsub.s32 %v1414_v15, %v2027_v52 }
 0x3ba   : > { %1348 = vperm.xlu1 %1789, %v1345_v27  }
 0x3bb   : > { %v1762_v29 = vpop.f32.mrb[40].mxu1 }
 0x3bc   : > { %v1244_v30 = vadd.f32 %v1762_v29, %v2150_v22  ;;  %v1235_v31 = vpop.f32.mrb[41].mxu1  ;;  %1329 = vadd.xlane.f32.xlu0 %v1305_v60 }
 0x3bd   : > { %v1236_v32 = vadd.f32 %v2150_v22, %v1235_v31  ;;  %v1763_v33 = vpop.f32.mrb[42].mxu1  ;;  %v1442_v31 = vadd.s32 4294967232, %v2190_v1 }
 0x3be   : > { %v1264_v34 = vmax.f32 %v1244_v30, 0.0  ;;  %v1247_v35 = vadd.f32 %v1763_v33, %v2150_v22  ;;  %v1238_v37 = vpop.f32.mrb[43].mxu1  ;;  %v1435_v30 = vadd.s32 4294967240, %v2190_v1  ;;  %v1449_v33 = vadd.s32 4294967224, %v2190_v1 }
 0x3bf   : > { %v1262_v39 = vmax.f32 %v1236_v32, 0.0  ;;  %v1239_v40 = vadd.f32 %v2150_v22, %v1238_v37 }
 0x3c0   : > { %v1265_v41 = vmax.f32 %v1247_v35, 0.0  ;;  %1331 = vadd.xlane.f32.xlu0 %v1306_v38 }
 0x3c1   : > { %v1263_v42 = vmax.f32 %v1239_v40, 0.0  ;;  %v1445_v40 = vsub.s32 %v1442_v31, %v2027_v52 }
 0x3c2   : > { %v1273_v43 = vpack.c.bf16 %v1265_v41, %v1264_v34 }
 0x3c3   : > { %v1272_v44 = vpack.c.bf16 %v1263_v42, %v1262_v39  ;;  %v1438_v39 = vsub.s32 %v1435_v30, %v2027_v52 }
 0x3c4   : > { %v1288_v45 = vunpack.c.l.bf16 %v1273_v43  ;;  %v1289_v49 = vunpack.c.h.bf16 %v1273_v43 }
 0x3c5   : > { %v1286_v47 = vunpack.c.l.bf16 %v1272_v44  ;;  %v1287_v57 = vunpack.c.h.bf16 %v1272_v44  ;;  %v1452_v44 = vsub.s32 %v1449_v33, %v2027_v52 }
 0x3c6   : > { %v1311_v46 = vmul.f32 %v2159_v36, %v1288_v45  ;;  %v1312_v22 = vmul.f32 %v2159_v36, %v1289_v49 }
 0x3c7   : > { %v1309_v56 = vmul.f32 %v2159_v36, %v1286_v47  ;;  %v1310_v48 = vmul.f32 %v2159_v36, %v1287_v57  ;;  %v1393_v36 = vadd.s32 4294967288, %v2190_v1  ;;  %v1456_v47 = vadd.s32 4294967216, %v2190_v1 }
 0x3c8   : > { %1341 = vadd.xlane.f32.xlu0 %v1311_v46  ;;  %v1463_v57 = vadd.s32 4294967208, %v2190_v1 }
 0x3c9   : > { %v1396_v8 = vsub.s32 %v1393_v36, %v2027_v52 }
 0x3cc   : > { %1337 = vadd.xlane.f32.xlu0 %v1309_v56 }
 0x3d0   : > { %1339 = vadd.xlane.f32.xlu0 %v1310_v48 }
 0x3d4   : > { %1343 = vadd.xlane.f32.xlu0 %v1312_v22  ;;  %v1470_v22 = vadd.s32 4294967200, %v2190_v1 }
 0x3d6   : > { %v1473_v5 = vsub.s32 %v1470_v22, %v2027_v52 }
 0x3de   : > { %1335 = vadd.xlane.f32.xlu1 %v1308_v26  ;;  %v1428_v26 = vadd.s32 4294967248, %v2190_v1 }
 0x3e0   : > { %v1431_v37 = vsub.s32 %v1428_v26, %v2027_v52 }
 0x425   : > { %v1318_v59 = vpop.xlane.xlu1 %1317 }
 0x426   : > { %v1314_v50 = vpop.xlane.xlu0 %1313 }
 0x429   : > { %v1320_v62 = vpop.xlane.xlu1 %1319 }
 0x42a   : > { %v1316_v54 = vpop.xlane.xlu0 %1315 }
 0x435   : > { %v1326_v61 = vpop.xlane.xlu0 %1325 }
 0x436   : > { %v1324_v0 = vpop.xlane.xlu1 %1323 }
 0x439   : > { %v1322_v63 = vpop.xlane.xlu0 %1321 }
 0x43a   : > { %v1349_v2 = vpop.permute.xlu1 %1348 }
 0x43b   : > { %v2196_v4 = vrot.slane %v1349_v2, %v420_v53  ;;  %v1466_v2 = vsub.s32 %v1463_v57, %v2027_v52 }
 0x43d   : > { %v1328_v55 = vpop.xlane.xlu0 %1327  ;;  %v1355_v7 = vadd.f32 %v2196_v4, %v1314_v50  ;;  %v1356_v58 = vadd.f32 %v2196_v4, %v1316_v54  ;;  %v1357_v9 = vadd.f32 %v2196_v4, %v1318_v59  ;;  %v1358_v16 = vadd.f32 %v2196_v4, %v1320_v62 }
 0x43e   : > { %v1359_v21 = vadd.f32 %v2196_v4, %v1322_v63  ;;  %v1360_v27 = vadd.f32 %v2196_v4, %v1324_v0  ;;  %v1361_v34 = vadd.f32 %v2196_v4, %v1326_v61  ;;  %v1362_v43 = vadd.f32 %v2196_v4, %v1328_v55 }
 0x43f   : > { %v1392_v53 = vrot.slane %v1355_v7, %v1391_v51  ;;  %v1397_v11 = vrot.slane %v1356_v58, %v1396_v8  ;;  %v1404_v14 = vrot.slane %v1357_v9, %v1403_v10  ;;  %v1411_v25 = vrot.slane %v1358_v16, %v1410_v18 }
 0x440   : > { %v1418_v29 = vrot.slane %v1359_v21, %v1417_v24  ;;  %v1425_v38 = vrot.slane %v1360_v27, %v1424_v28  ;;  %v1432_v46 = vrot.slane %v1361_v34, %v1431_v37  ;;  %v1439_v50 = vrot.slane %v1362_v43, %v1438_v39 }
 0x441   : > { %v1399_v17 = vsel %vm1398_vm1, %v1397_v11, %v1392_v53  ;;  %v1477_v59 = vadd.s32 4294967192, %v2190_v1  ;;  %v1459_v61 = vsub.s32 %v1456_v47, %v2027_v52  ;;  %v1484_v63 = vadd.s32 4294967184, %v2190_v1 }
 0x442   : > { %v1406_v23 = vsel %vm1405_vm2, %v1404_v14, %v1399_v17  ;;  %v1491_v55 = vadd.s32 4294967176, %v2190_v1 }
 0x443   : > { %v1413_v60 = vsel %vm1412_vm3, %v1411_v25, %v1406_v23  ;;  %v1480_v51 = vsub.s32 %v1477_v59, %v2027_v52  ;;  %v1487_v10 = vsub.s32 %v1484_v63, %v2027_v52 }
 0x444   : > { %v1420_v35 = vsel %vm1419_vm4, %v1418_v29, %v1413_v60  ;;  %v1494_v11 = vsub.s32 %v1491_v55, %v2027_v52 }
 0x445   : > { %v2192_v3 = vpop.xlane.xlu0 %1333  ;;  %v1427_v42 = vsel %vm1426_vm5, %v1425_v38, %v1420_v35 }
 0x446   : > { %v1434_v48 = vsel %vm1433_vm6, %v1432_v46, %v1427_v42  ;;  %v1365_v62 = vadd.f32 %v2196_v4, %v2192_v3 }
 0x447   : > { %v1441_v0 = vsel %vm1440_vm7, %v1439_v50, %v1434_v48 }
 0x448   : > { %v1460_v9 = vrot.slane %v1365_v62, %v1459_v61 }
 0x449   : > { %v1330_v6 = vpop.xlane.xlu0 %1329 }
 0x44a   : > { %v1363_v41 = vadd.f32 %v2196_v4, %v1330_v6 }
 0x44c   : > { %v1446_v49 = vrot.slane %v1363_v41, %v1445_v40 }
 0x44d   : > { %v1332_v13 = vpop.xlane.xlu0 %1331 }
 0x44e   : > { %v1364_v45 = vadd.f32 %v2196_v4, %v1332_v13  ;;  %v1448_v36 = vsel %vm1447_vm8, %v1446_v49, %v1441_v0 }
 0x450   : > { %v1453_v54 = vrot.slane %v1364_v45, %v1452_v44 }
 0x452   : > { %v1455_v3 = vsel %vm1454_vm9, %v1453_v54, %v1448_v36 }
 0x453   : > { %v1462_v15 = vsel %vm1461_vm10, %v1460_v9, %v1455_v3 }
 0x455   : > { %v1342_v19 = vpop.xlane.xlu0 %1341 }
 0x456   : > { %v1369_v53 = vadd.f32 %v2196_v4, %v1342_v19 }
 0x458   : > { %v1488_v18 = vrot.slane %v1369_v53, %v1487_v10 }
 0x459   : > { %v1338_v32 = vpop.xlane.xlu0 %1337 }
 0x45a   : > { %v1367_v6 = vadd.f32 %v2196_v4, %v1338_v32 }
 0x45c   : > { %v1474_v14 = vrot.slane %v1367_v6, %v1473_v5 }
 0x45d   : > { %v1340_v56 = vpop.xlane.xlu0 %1339 }
 0x45e   : > { %v1368_v8 = vadd.f32 %v2196_v4, %v1340_v56 }
 0x460   : > { %v1481_v16 = vrot.slane %v1368_v8, %v1480_v51 }
 0x461   : > { %v1344_v7 = vpop.xlane.xlu0 %1343 }
 0x462   : > { %v1370_v12 = vadd.f32 %v2196_v4, %v1344_v7 }
 0x464   : > { %v1495_v19 = vrot.slane %v1370_v12, %v1494_v11 }
 0x46b   : > { %v1336_v58 = vpop.xlane.xlu1 %1335 }
 0x46c   : > { %v1366_v1 = vadd.f32 %v2196_v4, %v1336_v58 }
 0x46e   : > { %v1467_v13 = vrot.slane %v1366_v1, %v1466_v2 }
 0x470   : > { %v1469_v17 = vsel %vm1468_vm11, %v1467_v13, %v1462_v15 }
 0x471   : > { %v1476_v20 = vsel %vm1475_vm12, %v1474_v14, %v1469_v17 }
 0x472   : > { %v1483_v52 = vsel %vm1482_vm13, %v1481_v16, %v1476_v20 }
 0x473   : > { %v1490_v4 = vsel %vm1489_vm14, %v1488_v18, %v1483_v52 }
 0x474   : > { %v1497_v21 = vsel %vm1496_vm15, %v1495_v19, %v1490_v4 }
 0x475   : > { %1499 = vst [vmem:[%s386_s18] sm:$0x1] %v1497_v21 }
 0x476 PF: > { %s23_s19 = sadd.s32 1, %s1835_s19  }
 0x477   : > { %p20_p5 = scmp.ge.s32.totalorder %s23_s19, 6  }
 0x479   :  { %22 = sbr.rel (!%p20_p5) target bundleno = 3 (0x3), region = 94 }

</bundles_post_ra>
